<compile_context>
chip_gen: v6e
topology: v6e:2x2x1
jax: 0.10.0
libtpu: 0.0.40
codegen_flags: <defaults>
</compile_context>

<pallas_src>
from collections import defaultdict
from functools import partial

import numpy as np
import jax
import jax.numpy as jnp
from jax.experimental import pallas as pl
from jax.experimental.pallas import tpu as pltpu


def _round_up(x, m):
    return ((x + m - 1) // m) * m


_GATHER_ROWS_PER_STEP = 8  # output block sublane height (keeps (8,128) alignment)


# ---------------------------------------------------------------------------
# Pallas kernels
# ---------------------------------------------------------------------------
def _insert_kernel(meta_ref, val_ref, mem_in_ref, mem_out_ref):
    """Circular insert of one class's rows into that class's slice of the bank.

    meta_ref:    SMEM (G, 4) int32 rows = (class_idx, start, nvalid, val_offset)
    val_ref:     VMEM (M_pad, PAD) f32  batch values grouped (stably sorted) by class
    mem_in_ref:  VMEM (N, PAD)          current class slice (selected by index_map)
    mem_out_ref: VMEM (N, PAD)          aliased, in-place-updated class slice
    """
    g = pl.program_id(0)
    start = meta_ref[g, 1]
    nvalid = meta_ref[g, 2]
    voff = meta_ref[g, 3]
    n_rows = mem_in_ref.shape[0]

    # Carry the untouched rows of this class slice through (the whole bank is
    # aliased in place at the HBM level; only this class slice round-trips
    # through VMEM).
    mem_out_ref[...] = mem_in_ref[...]

    # nvalid is dynamic, so pl.ds (static size) can't express the slab store in
    # one shot -> short loop of lane-dense single-row dynamic-slice stores.
    def body(i, carry):
        row = start + i
        row = jnp.where(row >= n_rows, row - n_rows, row)  # wrap (start < N, i < N)
        mem_out_ref[pl.ds(row, 1), :] = val_ref[pl.ds(voff + i, 1), :]
        return carry

    jax.lax.fori_loop(0, nvalid, body, 0)


def _gather_kernel(cls_ref, row_ref, bank_hbm, out_ref, sem):
    """DMA gather: out block row i  <-  bank[cls[8k+i], row[8k+i], :].

    bank_hbm stays in HBM (pl.ANY); 8 overlapped row DMAs per grid step land
    directly in the (8, PAD) VMEM output block (bit-exact copy, no MXU).
    """
    k = pl.program_id(0)
    base = k * _GATHER_ROWS_PER_STEP

    copies = []
    for i in range(_GATHER_ROWS_PER_STEP):
        c = cls_ref[base + i]
        r = row_ref[base + i]
        copies.append(
            pltpu.make_async_copy(
                bank_hbm.at[c, pl.ds(r, 1), :],
                out_ref.at[pl.ds(i, 1), :],
                sem.at[i],
            )
        )
    for cp in copies:   # issue all 8 first so the DMAs overlap
        cp.start()
    for cp in copies:
        cp.wait()


# ---------------------------------------------------------------------------
# Pallas wrappers (jitted; bank is donated for a true in-place insert)
# ---------------------------------------------------------------------------
def _fused_circular_insert(bank, values, meta):
    """bank: (C, N, PAD) f32, values: (M_pad, PAD) f32, meta: (G, 4) int32."""
    C, N, PAD = bank.shape
    M_pad = values.shape[0]
    G = meta.shape[0]
    return pl.pallas_call(
        _insert_kernel,
        out_shape=jax.ShapeDtypeStruct((C, N, PAD), bank.dtype),
        grid_spec=pltpu.PrefetchScalarGridSpec(
            num_scalar_prefetch=1,
            grid=(G,),
            in_specs=[
                pl.BlockSpec((M_pad, PAD), lambda g, m: (0, 0)),
                pl.BlockSpec((None, N, PAD), lambda g, m: (m[g, 0], 0, 0)),
            ],
            out_specs=pl.BlockSpec((None, N, PAD), lambda g, m: (m[g, 0], 0, 0)),
        ),
        # call args are (meta, values, bank) -> bank is flat operand 2; alias it
        # with output 0 so untouched classes keep their data.
        input_output_aliases={2: 0},
        compiler_params=pltpu.CompilerParams(dimension_semantics=("arbitrary",)),
    )(meta, values, bank)


# donate the bank so XLA actually reuses the buffer instead of inserting a
# defensive full-bank copy before the aliased pallas_call.
fused_circular_insert = jax.jit(_fused_circular_insert, donate_argnums=(0,))


def _fused_gather_rows(bank, cls_idx, row_idx):
    """bank: (C, N, PAD) f32, cls_idx/row_idx: (K_pad,) int32.  Returns (K_pad, PAD)."""
    C, N, PAD = bank.shape
    K_pad = cls_idx.shape[0]
    assert K_pad % _GATHER_ROWS_PER_STEP == 0
    return pl.pallas_call(
        _gather_kernel,
        out_shape=jax.ShapeDtypeStruct((K_pad, PAD), bank.dtype),
        grid_spec=pltpu.PrefetchScalarGridSpec(
            num_scalar_prefetch=2,
            grid=(K_pad // _GATHER_ROWS_PER_STEP,),
            in_specs=[pl.BlockSpec(memory_space=pl.ANY)],
            out_specs=pl.BlockSpec(
                (_GATHER_ROWS_PER_STEP, PAD), lambda k, ci, ri: (k, 0)
            ),
            scratch_shapes=[pltpu.SemaphoreType.DMA((_GATHER_ROWS_PER_STEP,))],
        ),
        compiler_params=pltpu.CompilerParams(dimension_semantics=("arbitrary",)),
    )(cls_idx, row_idx, bank)


fused_gather_rows = jax.jit(_fused_gather_rows)


# ---------------------------------------------------------------------------
# Memory module (JAX / Pallas version of fsdet Memory)
# ---------------------------------------------------------------------------
class MemoryPallas:
    def __init__(self, num_instance, memory_dim, fc_dim, cls_mapping, keepclass):
        C = len(keepclass)
        self.num_classes = C
        self.num_instance = num_instance
        self.memory_dim = memory_dim
        self.fc_dim = fc_dim
        # fused lane-dense slabs: [feature | deltas(4) | scale(1) | zero pad]
        self.prop_pad = _round_up(memory_dim + 5, 128)
        self.roi_pad = _round_up(fc_dim + 5, 128)
        self.proposal_memory = jnp.zeros((C, num_instance, self.prop_pad), jnp.float32)
        self.roi_memory = jnp.zeros((C, num_instance, self.roi_pad), jnp.float32)

        self.roi_ptr = defaultdict(int)
        self.prop_ptr = defaultdict(int)
        self.roi_max = defaultdict(int)
        self.prop_max = defaultdict(int)

        cls_idx = [cls_mapping[x] for x in keepclass]
        self.mapping = {k - 1: v for k, v in zip(cls_idx, range(len(cls_idx)))}
        self.reverse_mapping = {v: k for k, v in self.mapping.items()}

        self._sample_rng = np.random.default_rng(0)  # deterministic torch.randperm stand-in

        # kept for debugging / tests
        self._last_prop_idx = np.zeros((0,), np.int32)
        self._last_roi_idx = np.zeros((0,), np.int32)

    # ---- convenience views matching the original buffer names --------------
    @property
    def proposal_feature_memory(self):
        return self.proposal_memory[:, :, :self.memory_dim]

    @property
    def proposal_delta_memory(self):
        return self.proposal_memory[:, :, self.memory_dim:self.memory_dim + 4]

    @property
    def proposal_scale_memory(self):
        return self.proposal_memory[:, :, self.memory_dim + 4]

    @property
    def roi_feature_memory(self):
        return self.roi_memory[:, :, :self.fc_dim]

    @property
    def roi_delta_memory(self):
        return self.roi_memory[:, :, self.fc_dim:self.fc_dim + 4]

    @property
    def roi_scale_memory(self):
        return self.roi_memory[:, :, self.fc_dim + 4]

    # ---- insert -------------------------------------------------------------
    def _insert_branch(self, bank, ptr, maxd, classes, feats, deltas, scales,
                       feat_dim, pad):
        classes = np.asarray(classes).reshape(-1)
        if classes.size == 0:
            return bank
        N = self.num_instance

        feats = np.asarray(feats, np.float32)
        deltas = np.asarray(deltas, np.float32)
        scales = np.asarray(scales, np.float32).reshape(-1)

        order = np.argsort(classes, kind="stable")     # group rows by class, keep order
        sorted_cls = classes[order]

        meta_rows = []
        for cid_raw in np.unique(classes):             # sorted, like tensor.unique()
            cid = self.mapping[int(cid_raw)]
            sel = np.nonzero(sorted_cls == cid_raw)[0]
            voff = int(sel[0])
            n = int(sel.shape[0])
            # TODO(synk): original insert_queue supports a value longer than the
            # queue (recursive overwrite); this implementation assumes n <= N.
            assert n <= N, "per-class insert larger than queue not supported"
            start = ptr[cid] % N
            meta_rows.append((cid, start, n, voff))
            # pointer bookkeeping (matches original insert_queue return value)
            new_m_idx = start + n
            if new_m_idx > N:
                new_m_idx -= N
            ptr[cid] = new_m_idx
            if maxd[cid] < new_m_idx:
                maxd[cid] = new_m_idx
            elif maxd[cid] > new_m_idx:
                maxd[cid] = N

        M = classes.size
        M_pad = max(_round_up(M, 8), 8)                # bucketed -> fewer recompiles
        slab = np.zeros((M_pad, pad), np.float32)
        slab[:M, :feat_dim] = feats[order]
        slab[:M, feat_dim:feat_dim + 4] = deltas[order]
        slab[:M, feat_dim + 4] = scales[order]

        meta = np.asarray(meta_rows, np.int32)
        return fused_circular_insert(bank, jnp.asarray(slab), jnp.asarray(meta))

    # ---- sample -------------------------------------------------------------
    def _sample_branch(self, bank, maxd, gt_class, sample_rate, feat_dim):
        N = self.num_instance
        cls_idx, row_idx, cls_out = [], [], []
        for cid_raw in gt_class:
            cid = self.mapping[int(cid_raw)]
            length = maxd[cid]
            k = max(int(length * sample_rate), 10)
            idx = self._sample_rng.permutation(length)[:k]
            if idx.size == 0:
                continue
            cls_idx.append(np.full((idx.size,), cid, np.int32))
            row_idx.append(idx.astype(np.int32))
            cls_out.append(np.full((idx.size,), float(cid_raw), np.float32))

        if not cls_idx:
            return (jnp.zeros((0, feat_dim), jnp.float32),
                    jnp.zeros((0, 4), jnp.float32),
                    jnp.zeros((0,), jnp.float32),
                    jnp.zeros((0,), jnp.float32),
                    np.zeros((0,), np.int32))

        cls_idx = np.concatenate(cls_idx)
        row_idx = np.concatenate(row_idx)
        cls_out = np.concatenate(cls_out)
        K = cls_idx.shape[0]
        K_pad = max(_round_up(K, _GATHER_ROWS_PER_STEP), _GATHER_ROWS_PER_STEP)
        pc = np.zeros((K_pad,), np.int32)              # pad rows gather (0, 0); sliced off
        pr = np.zeros((K_pad,), np.int32)
        pc[:K] = cls_idx
        pr[:K] = row_idx

        gathered = fused_gather_rows(bank, jnp.asarray(pc), jnp.asarray(pr))[:K]
        flat_idx = (cls_idx.astype(np.int64) * N + row_idx).astype(np.int32)
        return (gathered[:, :feat_dim],
                gathered[:, feat_dim:feat_dim + 4],
                gathered[:, feat_dim + 4],
                jnp.asarray(cls_out),
                flat_idx)

    # ---- forward ------------------------------------------------------------
    def forward(self, feature_dict=None, gt_class=None, sample_rate=0.1):
        assert not (feature_dict is not None and gt_class is not None)

        if feature_dict is None and gt_class is None:
            self.roi_ptr = defaultdict(int)
            self.prop_ptr = defaultdict(int)
            return None

        if feature_dict is not None:
            p = feature_dict['proposal']
            self.proposal_memory = self._insert_branch(
                self.proposal_memory, self.prop_ptr, self.prop_max,
                p['class'], p['feature'], p['deltas'], p['scale'],
                self.memory_dim, self.prop_pad)
            r = feature_dict['roi']
            self.roi_memory = self._insert_branch(
                self.roi_memory, self.roi_ptr, self.roi_max,
                r['class'], r['feature'], r['deltas'], r['scale'],
                self.fc_dim, self.roi_pad)
            return None

        pf, pd, ps, pc, self._last_prop_idx = self._sample_branch(
            self.proposal_memory, self.prop_max, gt_class, sample_rate, self.memory_dim)
        rf, rd, rs, rc, self._last_roi_idx = self._sample_branch(
            self.roi_memory, self.roi_max, gt_class, sample_rate, self.fc_dim)
        return {
            'proposal': {'feature': pf, 'deltas': pd, 'scale': ps, 'class': pc},
            'roi': {'feature': rf, 'deltas': rd, 'scale': rs, 'class': rc},
        }


# ---------------------------------------------------------------------------
# Demo + self-checks
# ---------------------------------------------------------------------------
if __name__ == "__main__":
    NUM_INSTANCE = 16
    MEMORY_DIM = 32
    FC_DIM = 32
    keepclass = ["cat", "dog", "bird"]
    cls_mapping = {"cat": 1, "dog": 2, "bird": 3}    # -> mapping {0:0, 1:1, 2:2}

    mem = MemoryPallas(NUM_INSTANCE, MEMORY_DIM, FC_DIM, cls_mapping, keepclass)

    key = jax.random.PRNGKey(0)
    k1, k2, k3, k4, k5, k6 = jax.random.split(key, 6)

    prop_classes = jnp.array([0, 0, 0, 0, 0, 1, 1, 1, 1, 2, 2, 2], jnp.int32)
    prop_feature = jax.random.normal(k1, (12, MEMORY_DIM), jnp.float32)
    prop_deltas = jax.random.normal(k2, (12, 4), jnp.float32)
    prop_scale = jax.random.uniform(k3, (12,), jnp.float32)

    roi_classes = jnp.array([0, 0, 0, 1, 1, 1, 1, 2, 2, 2], jnp.int32)
    roi_feature = jax.random.normal(k4, (10, FC_DIM), jnp.float32)
    roi_deltas = jax.random.normal(k5, (10, 4), jnp.float32)
    roi_scale = jax.random.uniform(k6, (10,), jnp.float32)

    feature_dict = {
        'proposal': {'feature': prop_feature, 'deltas': prop_deltas,
                     'scale': prop_scale, 'class': prop_classes},
        'roi': {'feature': roi_feature, 'deltas': roi_deltas,
                'scale': roi_scale, 'class': roi_classes},
    }

    # numpy reference mirroring the original insert_queue semantics
    def np_insert_once(bank_np, ptrs, classes, feats, deltas, scales, mapping, N, D):
        classes = np.asarray(classes)
        feats = np.asarray(feats); deltas = np.asarray(deltas); scales = np.asarray(scales)
        for cid_raw in np.unique(classes):
            cid = mapping[int(cid_raw)]
            m = classes == cid_raw
            n = int(m.sum())
            q = ptrs[cid] % N
            rows = (q + np.arange(n)) % N
            bank_np[cid, rows, :D] = feats[m]
            bank_np[cid, rows, D:D + 4] = deltas[m]
            bank_np[cid, rows, D + 4] = scales[m]
            new = q + n
            if new > N:
                new -= N
            ptrs[cid] = new

    ref_prop = np.zeros((3, NUM_INSTANCE, mem.prop_pad), np.float32)
    ref_roi = np.zeros((3, NUM_INSTANCE, mem.roi_pad), np.float32)
    ref_prop_ptr = defaultdict(int)
    ref_roi_ptr = defaultdict(int)

    # mode 1: reset pointers
    mem.forward()

    # mode 2: insert 4x (exercises ring-buffer wrap-around); identical shapes
    # -> one Mosaic compilation reused for all insert calls of both banks.
    for _ in range(4):
        mem.forward(feature_dict=feature_dict)
        np_insert_once(ref_prop, ref_prop_ptr, prop_classes, prop_feature,
                       prop_deltas, prop_scale, mem.mapping, NUM_INSTANCE, MEMORY_DIM)
        np_insert_once(ref_roi, ref_roi_ptr, roi_classes, roi_feature,
                       roi_deltas, roi_scale, mem.mapping, NUM_INSTANCE, FC_DIM)
    jax.block_until_ready(mem.proposal_memory)
    jax.block_until_ready(mem.roi_memory)

    got_prop = np.asarray(mem.proposal_memory)
    got_roi = np.asarray(mem.roi_memory)
    assert np.array_equal(got_prop, ref_prop), "proposal circular insert mismatch"
    assert np.array_equal(got_roi, ref_roi), "roi circular insert mismatch"

    # mode 3: sample back from memory (one DMA-gather kernel per bank)
    out = mem.forward(gt_class=[0, 1, 2], sample_rate=0.1)
    jax.block_until_ready(out['proposal']['feature'])
    jax.block_until_ready(out['roi']['feature'])

    # gather correctness against the flat indices that were actually used
    bank2d = got_prop.reshape(-1, mem.prop_pad)
    want = bank2d[mem._last_prop_idx]
    assert np.array_equal(np.asarray(out['proposal']['feature']), want[:, :MEMORY_DIM])
    assert np.array_equal(np.asarray(out['proposal']['deltas']),
                          want[:, MEMORY_DIM:MEMORY_DIM + 4])
    assert np.array_equal(np.asarray(out['proposal']['scale']), want[:, MEMORY_DIM + 4])

    bank2d_r = got_roi.reshape(-1, mem.roi_pad)
    want_r = bank2d_r[mem._last_roi_idx]
    assert np.array_equal(np.asarray(out['roi']['feature']), want_r[:, :FC_DIM])

    # shape sanity (matches the original module's outputs)
    assert out['proposal']['feature'].shape[1] == MEMORY_DIM
    assert out['roi']['feature'].shape[1] == FC_DIM
    assert out['proposal']['deltas'].shape[1] == 4
    assert out['proposal']['scale'].shape == out['proposal']['class'].shape
    assert out['roi']['scale'].shape == out['roi']['class'].shape

    print("KERNEL_OK")
</pallas_src>

<mosaic_0001>
module attributes {stable_mosaic.version = 11 : i64} {
  func.func @_insert_kernel(%arg0: i32, %arg1: memref<3x4xi32, #tpu.memory_space<smem>>, %arg2: memref<16x128xf32, #tpu.memory_space<vmem>>, %arg3: memref<1x16x128xf32, #tpu.memory_space<vmem>>, %arg4: memref<1x16x128xf32, #tpu.memory_space<vmem>>) attributes {dimension_semantics = [#tpu.dimension_semantics<arbitrary>], iteration_bounds = array<i64: 3>, scalar_prefetch = 1 : i64, scratch_operands = 0 : i64, tpu.core_type = #tpu.core_type<tc>, window_params = [{pipeline_mode = #tpu.pipeline_mode<synchronous>, transform_indices = @transform_0, window_bounds = array<i64: 16, 128>}, {transform_indices = @transform_1, window_bounds = array<i64: 1, 16, 128>}, {transform_indices = @transform_2, window_bounds = array<i64: 1, 16, 128>}]} {
    %0 = arith.index_cast %arg0 : i32 to index
    %c1 = arith.constant 1 : index
    %1 = memref.load %arg1[%0, %c1] : memref<3x4xi32, #tpu.memory_space<smem>>
    %2 = arith.index_cast %arg0 : i32 to index
    %c2 = arith.constant 2 : index
    %3 = memref.load %arg1[%2, %c2] : memref<3x4xi32, #tpu.memory_space<smem>>
    %4 = arith.index_cast %arg0 : i32 to index
    %c3 = arith.constant 3 : index
    %5 = memref.load %arg1[%4, %c3] : memref<3x4xi32, #tpu.memory_space<smem>>
    %c0 = arith.constant 0 : index
    %c0_0 = arith.constant 0 : index
    %c0_1 = arith.constant 0 : index
    %6 = vector.load %arg3[%c0, %c0_0, %c0_1] : memref<1x16x128xf32, #tpu.memory_space<vmem>>, vector<1x16x128xf32>
    %7 = vector.shape_cast %6 : vector<1x16x128xf32> to vector<16x128xf32>
    %c0_2 = arith.constant 0 : index
    %c0_3 = arith.constant 0 : index
    %c0_4 = arith.constant 0 : index
    %8 = vector.load %arg4[%c0_2, %c0_3, %c0_4] : memref<1x16x128xf32, #tpu.memory_space<vmem>>, vector<1x16x128xf32>
    %9 = vector.shape_cast %8 : vector<1x16x128xf32> to vector<16x128xf32>
    %10 = vector.shape_cast %7 : vector<16x128xf32> to vector<1x16x128xf32>
    tpu.vector_store %arg4[%c0_2, %c0_3, %c0_4], %10 {strides = array<i32>} : memref<1x16x128xf32, #tpu.memory_space<vmem>>, vector<1x16x128xf32>,
    %c0_i32 = arith.constant 0 : i32
    %c0_i32_5 = arith.constant 0 : i32
    %11 = arith.subi %3, %c0_i32_5 : i32
    %12 = arith.addi %c0_i32_5, %11 : i32
    %c1_i32 = arith.constant 1 : i32
    scf.for %arg5 = %c0_i32_5 to %12 step %c1_i32  : i32 {
      %13 = arith.addi %1, %arg5 : i32
      %c16_i32 = arith.constant 16 : i32
      %14 = arith.cmpi sge, %13, %c16_i32 : i32
      %c16_i32_6 = arith.constant 16 : i32
      %15 = arith.subi %13, %c16_i32_6 : i32
      %16 = arith.select %14, %15, %13 : i32
      %17 = arith.addi %5, %arg5 : i32
      %18 = arith.index_cast %17 : i32 to index
      %c0_7 = arith.constant 0 : index
      %19 = vector.load %arg2[%18, %c0_7] : memref<16x128xf32, #tpu.memory_space<vmem>>, vector<1x128xf32>
      %c0_8 = arith.constant 0 : index
      %20 = arith.index_cast %16 : i32 to index
      %c0_9 = arith.constant 0 : index
      %21 = vector.load %arg4[%c0_8, %20, %c0_9] : memref<1x16x128xf32, #tpu.memory_space<vmem>>, vector<1x1x128xf32>
      %22 = vector.shape_cast %21 : vector<1x1x128xf32> to vector<1x128xf32>
      %23 = vector.shape_cast %19 : vector<1x128xf32> to vector<1x1x128xf32>
      tpu.vector_store %arg4[%c0_8, %20, %c0_9], %23 {strides = array<i32>} : memref<1x16x128xf32, #tpu.memory_space<vmem>>, vector<1x1x128xf32>,
    }
    return
  }
  func.func @transform_0(%arg0: i32, %arg1: memref<3x4xi32, #tpu.memory_space<smem>>) -> (i32, i32) {
    %c0_i32 = arith.constant 0 : i32
    %c0_i32_0 = arith.constant 0 : i32
    %c0_i32_1 = arith.constant 0 : i32
    return %c0_i32, %c0_i32_0 : i32, i32
  }
  func.func @transform_1(%arg0: i32, %arg1: memref<3x4xi32, #tpu.memory_space<smem>>) -> (i32, i32, i32) {
    %0 = arith.index_cast %arg0 : i32 to index
    %c0 = arith.constant 0 : index
    %1 = memref.load %arg1[%0, %c0] : memref<3x4xi32, #tpu.memory_space<smem>>
    %c0_i32 = arith.constant 0 : i32
    %c0_i32_0 = arith.constant 0 : i32
    %c0_i32_1 = arith.constant 0 : i32
    return %1, %c0_i32, %c0_i32_0 : i32, i32, i32
  }
  func.func @transform_2(%arg0: i32, %arg1: memref<3x4xi32, #tpu.memory_space<smem>>) -> (i32, i32, i32) {
    %0 = arith.index_cast %arg0 : i32 to index
    %c0 = arith.constant 0 : index
    %1 = memref.load %arg1[%0, %c0] : memref<3x4xi32, #tpu.memory_space<smem>>
    %c0_i32 = arith.constant 0 : i32
    %c0_i32_0 = arith.constant 0 : i32
    %c0_i32_1 = arith.constant 0 : i32
    return %1, %c0_i32, %c0_i32_0 : i32, i32, i32
  }
}

</mosaic_0001>

<bundles_post_ra>
// kernel: _fused_circular_insert.1
= control target key start
LH: loop header
LB: loop body
LE: loop exit
PB: predicated region body
PF: predicated region fallthrough
CT: control target
= control target key end

     0   :  { %s628_s12 = smov [#allocation3]   ;;  %s894_s0 = inlined_call_operand.hbm [shape: s32[3,4], index: 0, kind: input, shape index: {}]   ;;  %s895_s1 = inlined_call_operand.hbm [shape: f32[16,128], index: 1, kind: input, shape index: {}]   ;;  %s896_s2 = inlined_call_operand.hbm [shape: f32[3,16,128], index: 2, kind: input, shape index: {}, may-alias: {2,3}]   ;;  %s897_s3 = inlined_call_operand.hbm [shape: f32[3,16,128], index: 3, kind: output, shape index: {}, may-alias: {2,3}]  }
   0x1   :  { %9 = dma.hbm_to_smem %s894_s0, 64, %s628_s12, [#allocation2] }
   0x2   :  { %582 = dma.done.wait [#allocation2], 64 }
   0x3   :  { %583 = vsyncadd [#allocation2], 4294967232 }
   0x4   :  { %11 = sfence }
   0x5   :  { %12 = vsyncpa [#allocation5], 0 }
   0x6   :  { %13 = vsyncpa [#allocation8], 0 }
   0x7   :  { %15 = vsyncpa [#allocation8 + $0x1], 0 }
   0x8   :  { %16 = vsyncpa [#allocation6], 0 }
   0x9   :  { %18 = vsyncpa [#allocation6 + $0x1], 0  ;;  %s659_s15 = smov 0   ;;  %s661_s16 = smov 0  }
   0xa   :  { %s663_s17 = smov 0   ;;  %s665_s18 = smov 0  }
   0xb   :  { %s667_s19 = smov 0   ;;  %s669_s20 = smov 0  }
   0xc   :  { %s671_s0 = smov 0  }
   0xd LB: > { %s693_s21 = sadd.s32 4294967295, %s622_s0   ;;  %s331_s22 = sadd.s32 4294967294, %s622_s0   ;;  %s622_s0 = sphi %s671_s0, %s24_s0   ;;  %s618_s20 = sphi %s669_s20, %s922_s20   ;;  %s614_s19 = sphi %s667_s19, %s921_s19   ;;  %s610_s18 = sphi %s665_s18, %s920_s18   ;;  %s606_s17 = sphi %s663_s17, %s919_s17   ;;  %s602_s16 = sphi %s661_s16, %s918_s16   ;;  %s598_s15 = sphi %s659_s15, %s917_s15  }
   0xe   : > { %p69_p0 = scmp.ne.s32.totalorder %s614_s19, %s610_s18  ;;  %p899_p1 = scmp.eq.s32.totalorder %s693_s21, 0 }
   0xf   : > { %p96_p2 = scmp.ne.s32.totalorder %s606_s17, %s602_s16  ;;  %p97_p4 = scmp.eq.s32.totalorder %s693_s21, 2 }
  0x10   : > { %p702_p3 = por %p899_p1, %p69_p0  ;;  %p102_p5 = scmp.ne.s32.totalorder %s602_s16, %s598_s15 }
  0x11   : > { %p103_p6 = scmp.eq.s32.totalorder %s331_s22, 2  ;;  %p709_p7 = por %p97_p4, %p96_p2 }
  0x12   : > { %s903_s23 = scalar_select %p702_p3, 1, 0 }
  0x13   : > { %s904_s24 = scalar_select %p709_p7, 1, 0 }
  0x14   : > { %p336_p8 = scmp.ge.s32.totalorder %s622_s0, 1  ;;  %p714_p9 = por %p103_p6, %p102_p5 }
  0x15   : > { %p110_p10 = scmp.lt.s32.totalorder %s622_s0, 4  ;;  %s629_s27 = smov [#allocation4]  }
  0x16   : > { %s905_s25 = scalar_select %p714_p9, 1, 0 }
  0x17   : > { %p719_p11 = pnand %p336_p8, %p110_p10  ;;  %s122_s28 = sshll.u32 %s629_s27, 4  ;;  %s123_s28 = int_to_ptr.vmem [resolvable:$true] %s122_s28 }
  0x18   : > { %s732_s30 = sshll.u32 %s622_s0, 7  ;;  %s481_s5 = scalar_lea.vmem %s123_s28, 256 }
  0x19   : > { %s906_s26 = scalar_select %p719_p11, 1, 0 }
  0x1a   : > { %p374_p12 = pneg %p719_p11  ;;  %s50_s4 = sld [smem:[#allocation3 + %s732_s30]] }
  0x1b   : > { %p482_p2 = scmp.ne.s32.totalorder %s123_s28, %s481_s5  ;;  %p489_p6 = scmp.lt.s32.totalorder %s123_s28, %s123_s28 }
  0x1c   : > { %p727_p13 = pnand %p374_p12, %p899_p1  ;;  %p490_p8 = scmp.lt.s32.totalorder %s481_s5, %s481_s5 }
  0x1e   : > { %p472_p0 = pneg %p727_p13  ;;  %p491_p10 = por %p490_p8, %p489_p6 }
  0x20   : > { %p484_p4 = pnand %p482_p2, %p472_p0 }
  0x22   : > { %p485_p5 = pneg %p484_p4 }
  0x24   : > { %p492_p9 = pnand %p491_p10, %p485_p5 }
  0x26   : > { %495 = shalt.err (!%p492_p9)
}
  0x27   : > { %s898_s6 = smov 128   ;;  %s631_s7 = smov 8  }
  0x28   : > { %377 = dma.hbm_to_vmem [thread:$0]  (!%p727_p13), %s895_s1, 256, %s123_s28, [#allocation5], %s898_s6, %s898_s6, %s631_s7  }
  0x29   : > { %s357_s10 = sadd.s32 128, %s732_s30  ;;  %p63_p9 = scmp.ne.s32.totalorder %s618_s20, %s614_s19 }
  0x2a   : > { %s52_s11 = sld [smem:[#allocation3 + %s357_s10]]  ;;  %p64_p12 = scmp.eq.s32.totalorder %s622_s0, 0 }
  0x2b   : > { %s80_s12 = sld [smem:[#allocation3 + %s732_s30]]  ;;  %p389_p2 = scmp.lt.s32.totalorder %s622_s0, 3 }
  0x2c   : > { %s82_s13 = sld [smem:[#allocation3 + %s357_s10]]  ;;  %p750_p0 = por %p64_p12, %p63_p9 }
  0x2d   : > { %s86_s18 = sadd.s32 1, %s606_s17  ;;  %s56_s28 = sadd.s32 1, %s618_s20 }
  0x2e   : > { %p760_p13 = pnand %p389_p2, %p750_p0  ;;  %s136_s29 = sand.u32 1, %s618_s20  }
  0x2f   : > { %s339_s9 = sshll.u32 %s136_s29, 4  ;;  %s924_s30 = smov (!%p750_p0, %s732_s30), 0 }
  0x30   : > { %s53_s27 = ssub.s32 %s50_s4, %s52_s11  ;;  %s928_s30 = smov (!%p389_p2, %s924_s30), 0 }
  0x31   : > { %p54_p4 = scmp.eq.s32.totalorder %s53_s27, 0  ;;  %s140_s11 = scalar_lea.vmem [#allocation7], %s339_s9 }
  0x32   : > { %s83_s5 = ssub.s32 %s80_s12, %s82_s13  ;;  %s149_s27 = sshll.u32 %s140_s11, 4  ;;  %s781_s27 = int_to_ptr.vmem [resolvable:$true] %s149_s27 }
  0x33   : > { %s767_s8 = scalar_select %p54_p4, %s618_s20, %s56_s28  }
  0x34   : > { %p84_p5 = scmp.eq.s32.totalorder %s83_s5, 0  ;;  %s788_s14 = scalar_lea.sflag [#allocation8], %s136_s29 }
  0x35   : > { %s364_s10 = scalar_select %p750_p0, [#allocation3], [#allocation10] }
  0x36   : > { %s772_s6 = scalar_select %p84_p5, %s606_s17, %s86_s18  }
  0x37   : > { %s926_s10 = smov (!%p389_p2, %s364_s10), [#allocation12]  ;;  %p498_p8 = pneg %p760_p13 }
  0x38   : > { %s142_s4 = sld [smem:[%s926_s10 + %s928_s30]]  ;;  %s501_s10 = scalar_lea.hbm %s896_s2, 768 }
  0x3e   : > { %s360_s12 = sshll.u32 %s142_s4, 8 }
  0x3f   : > { %s786_s5 = scalar_lea.hbm %s896_s2, %s360_s12 }
  0x40   : > { %s496_s18 = scalar_lea.hbm %s786_s5, 256  ;;  %p502_p12 = scmp.lt.s32.totalorder %s786_s5, %s896_s2 }
  0x41   : > { %p497_p6 = scmp.ne.s32.totalorder %s786_s5, %s496_s18  ;;  %p503_p0 = scmp.lt.s32.totalorder %s501_s10, %s496_s18 }
  0x43   : > { %p499_p10 = pnand %p498_p8, %p497_p6  ;;  %p504_p2 = por %p503_p0, %p502_p12 }
  0x45   : > { %p500_p9 = pneg %p499_p10 }
  0x47   : > { %p505_p4 = pnand %p504_p2, %p500_p9 }
  0x49   : > { %508 = shalt.err (!%p505_p4)
}
  0x4a   : > { %s509_s29 = scalar_lea.vmem %s781_s27, 256  ;;  %s632_s12 = smov [#allocation7]  }
  0x4b   : > { %p510_p5 = scmp.ne.s32.totalorder %s781_s27, %s509_s29  ;;  %s514_s13 = sshll.u32 %s632_s12, 4  ;;  %s515_s13 = int_to_ptr.vmem [resolvable:$false] %s514_s13 }
  0x4c   : > { %s516_s28 = scalar_lea.vmem %s515_s13, 512  ;;  %p517_p10 = scmp.lt.s32.totalorder %s781_s27, %s515_s13 }
  0x4d   : > { %p512_p1 = pnand %p510_p5, %p498_p8  ;;  %p518_p7 = scmp.lt.s32.totalorder %s516_s28, %s509_s29 }
  0x4f   : > { %p513_p6 = pneg %p512_p1  ;;  %p519_p3 = por %p518_p7, %p517_p10 }
  0x51   : > { %p520_p11 = pnand %p519_p3, %p513_p6 }
  0x53   : > { %523 = shalt.err (!%p520_p11)
}
  0x54   : > { %s910_s18 = smov 128   ;;  %p911_p1 = scmp.ne.s32.totalorder %s906_s26, 0 }
  0x55   : > { %383 = dma.hbm_to_vmem [thread:$0]  (!%p760_p13), %s786_s5, 256, %s781_s27, %s788_s14, %s910_s18, %s910_s18, %s631_s7  }
  0x56   : > { %161 = sbr.rel (%p911_p1) target bundleno = 148 (0x94), region = 28  ;;  %p912_p8 = scmp.eq.s32.totalorder (!%p911_p1), %s693_s21, 0 }
  0x5b   : > { %585 = dma.done.wait (%p912_p8), [#allocation5], 256   ;;  %p913_p9 = pmov %p912_p8 }
  0x5c   : > { %s167_s30 = sand.u32 1, %s614_s19   ;;  %p914_p3 = scmp.ne.s32.totalorder %s903_s23, 0 }
  0x5d   : > { %587 = vsyncadd (%p913_p9), [#allocation5], 4294967040  ;;  %s345_s22 = sshll.u32 %s167_s30, 4  ;;  %s168_s9 = scalar_lea.sflag [#allocation8], %s167_s30 }
  0x5e   : > { %s171_s10 = scalar_lea.vmem [#allocation7], %s345_s22 }
  0x5f   : > { %589 = dma.done.wait (%p914_p3), %s168_s9, 256  }
  0x60   : > { %591 = vsyncadd (%p914_p3), %s168_s9, 4294967040  ;;  %s824_s26 = sshll.u32 %s693_s21, 7  ;;  %s189_s7 = sand.u32 1, %s602_s16   ;;  %v203_v0 = vld [vmem:[%s171_s10] sm:$0xff]  ;;  %v204_v1 = vld [vmem:[%s171_s10 + $0x8] sm:$0xff] }
  0x61   : > { %s197_s27 = sadd.s32 1, %s824_s26  ;;  %s199_s5 = sadd.s32 2, %s824_s26 }
  0x62   : > { %s198_s14 = sld [smem:[#allocation3 + %s197_s27]]  ;;  %s201_s4 = sadd.s32 3, %s824_s26 }
  0x63   : > { %s200_s11 = sld [smem:[#allocation3 + %s199_s5]]  ;;  %s346_s29 = sshll.u32 %s189_s7, 4 }
  0x64   : > { %s202_s12 = sld [smem:[#allocation3 + %s201_s4]]  ;;  %s191_s23 = scalar_lea.vmem [#allocation9], %s346_s29 }
  0x65   : > { %205 = vst [vmem:[%s191_s23] sm:$0xff] %v203_v0  ;;  %206 = vst [vmem:[%s191_s23 + $0x8] sm:$0xff] %v204_v1 }
  0x69   : > { %p348_p7 = scmp.le.s32.totalorder %s200_s11, 0 }
  0x6a   : > { %s624_s21 = smov (!%p348_p7), 0  }
  0x6b   : > { %295 = sbr.rel (%p348_p7) target bundleno = 122 (0x7a), region = 81 }
  0x70 LB: >> { %s213_s13 = sadd.s32 %s626_s21, %s198_s14  ;;  %s217_s28 = sadd.s32 %s626_s21, %s202_s12  ;;  %s626_s21 = sphi %s624_s21, %s210_s21  }
  0x71   : >> { %p214_p11 = scmp.ge.s32.totalorder %s213_s13, 16  ;;  %s349_s18 = sadd.s32 4294967280, %s213_s13 }
  0x72   : >> { %s218_s30 = scalar_lea.vmem [#allocation4], %s217_s28  ;;  %s210_s21 = sadd.s32 1, %s626_s21  }
  0x73   : >> { %s930_s18 = smov (!%p214_p11, %s349_s18), %s213_s13  ;;  %v219_v2 = vld [vmem:[%s218_s30] sm:$0x1]  ;;  %p209_p13 = scmp.ge.s32.totalorder %s210_s21, %s200_s11 }
  0x74   : >> { %s220_s22 = scalar_lea.vmem %s191_s23, %s930_s18 [#allocation9] }
  0x75   : >> { %221 = vst [vmem:[%s220_s22] sm:$0x1] %v219_v2  ;;  %212 = sbr.rel (!%p209_p13) target bundleno = 112 (0x70), region = 87 }
  0x7a PF: > { %p915_p12 = scmp.ne.s32.totalorder %s904_s24, 0  ;;  %s238_s27 = sshll.u32 %s191_s23, 4  ;;  %s837_s27 = int_to_ptr.vmem [resolvable:$true] %s238_s27 }
  0x7b   : > { %s846_s11 = scalar_lea.sflag [#allocation6], %s189_s7  ;;  %s524_s12 = scalar_lea.vmem %s837_s27, 256 }
  0x7c   : > { %s370_s9 = scalar_select %p915_p12, [#allocation3], [#allocation11] }
  0x7d   : > { %s932_s26 = smov (!%p915_p12, %s824_s26), 0  ;;  %p525_p0 = scmp.ne.s32.totalorder %s837_s27, %s524_s12 }
  0x7e   : > { %s231_s10 = sld [smem:[%s370_s9 + %s932_s26]]  ;;  %s633_s26 = smov [#allocation9]  }
  0x7f   : > { %p526_p2 = pnand %p525_p0, %p915_p12  ;;  %s528_s23 = sshll.u32 %s633_s26, 4  ;;  %s529_s23 = int_to_ptr.vmem [resolvable:$false] %s528_s23 }
  0x80   : > { %s530_s21 = scalar_lea.vmem %s529_s23, 512  ;;  %p531_p5 = scmp.lt.s32.totalorder %s837_s27, %s529_s23 }
  0x81   : > { %p527_p4 = pneg %p526_p2  ;;  %p532_p6 = scmp.lt.s32.totalorder %s530_s21, %s524_s12 }
  0x83   : > { %p533_p10 = por %p532_p6, %p531_p5 }
  0x84   : > { %s361_s5 = sshll.u32 %s231_s10, 8 }
  0x85   : > { %s842_s14 = scalar_lea.hbm %s897_s3, %s361_s5  ;;  %p534_p1 = pnand %p533_p10, %p527_p4 }
  0x87   : > { %537 = shalt.err (!%p534_p1)
}
  0x88   : > { %s538_s7 = scalar_lea.hbm %s842_s14, 256  ;;  %s542_s18 = scalar_lea.hbm %s897_s3, 768 }
  0x89   : > { %p539_p8 = scmp.ne.s32.totalorder %s842_s14, %s538_s7  ;;  %p543_p7 = scmp.lt.s32.totalorder %s842_s14, %s897_s3 }
  0x8a   : > { %p544_p11 = scmp.lt.s32.totalorder %s542_s18, %s538_s7 }
  0x8b   : > { %p540_p9 = pnand %p539_p8, %p915_p12 }
  0x8c   : > { %p545_p13 = por %p544_p11, %p543_p7 }
  0x8d   : > { %p541_p3 = pneg %p540_p9 }
  0x8f   : > { %p546_p0 = pnand %p545_p13, %p541_p3 }
  0x91   : > { %549 = shalt.err (!%p546_p0)
}
  0x92   : > { %s634_s9 = smov 128   ;;  %s635_s10 = smov 8  }
  0x93   : > { %372 = dma.vmem_to_hbm [thread:$0]  (%p915_p12), %s837_s27, 256, %s842_s14, %s846_s11, %s634_s9, %s634_s9, %s635_s10  }
  0x94 PF: > { %p391_p2 = scmp.ge.s32.totalorder %s622_s0, 2  ;;  %s253_s5 = sand.u32 1, %s598_s15  }
  0x95   : > { %p916_p4 = scmp.ne.s32.totalorder %s905_s25, 0  ;;  %s254_s4 = scalar_lea.sflag [#allocation6], %s253_s5 }
  0x97   : > { %p385_p5 = pnand %p391_p2, %p916_p4 }
  0x99   : > { %p386_p6 = pneg %p385_p5 }
  0x9b   : > { %593 = dma.done.wait (%p386_p6), %s254_s4, 256  }
  0x9c   : > { %595 = vsyncadd (%p386_p6), %s254_s4, 4294967040  ;;  %s24_s0 = sadd.s32 1, %s622_s0   ;;  %s917_s15 = smov %s602_s16 }
  0x9d   : > { %p21_p10 = scmp.ge.s32.totalorder %s24_s0, 5   ;;  %s918_s16 = smov %s606_s17 }
  0x9e   : > { %s919_s17 = smov %s772_s6  ;;  %s920_s18 = smov %s614_s19 }
  0x9f   : > { %s921_s19 = smov %s618_s20  ;;  %s922_s20 = smov %s767_s8 }
  0xa0   :  { %23 = sbr.rel (!%p21_p10) target bundleno = 13 (0xd), region = 98 }
  0xa5   :  { %259 = vsyncpa [#allocation5], 1 }
  0xa6   :  { %261 = vsyncpa [#allocation5 + $0x1], 1 }
  0xa7   :  { %262 = vsyncpa [#allocation8], 1 }
  0xa8   :  { %264 = vsyncpa [#allocation8 + $0x1], 1 }
  0xa9   :  { %265 = vsyncpa [#allocation6], 1 }
  0xaa   :  { %267 = vsyncpa [#allocation6 + $0x1], 1 }

</bundles_post_ra>
